<compile_context>
chip_gen: v7x
topology: tpu7x:2x2x1
jax: 0.10.0
libtpu: 0.0.40
codegen_flags: <defaults>
</compile_context>

<pallas_src>
import jax
import jax.numpy as jnp
from jax.experimental import pallas as pl
from jax.experimental.pallas import tpu as pltpu


def _round_up(x, m):
    return (x + m - 1) // m * m


def _simplenet_kernel(x_ref, wpack_ref, w2_ref, b3_ref, o_ref):
    # x_ref: (1, TB) f32 -- this batch tile, batch on the lane axis.
    x = x_ref[...]

    # Packed small params: columns are [w1, b1, b2, w3] as (H, 1) each.
    wp = wpack_ref[...]                       # (H, 4) f32
    w1 = wp[:, 0:1]
    b1 = wp[:, 1:2]
    b2 = wp[:, 2:3]
    w3 = wp[:, 3:4]

    # Layer 1: Linear(1 -> H) + ReLU.  K=1 contraction == outer product:
    # VPU broadcast multiply, not an MXU matmul.
    h1 = jnp.maximum(w1 * x + b1, 0.0)        # (H, TB) f32

    # Layer 2: Linear(H -> H) + ReLU.  bf16 operands, f32 MXU accumulation.
    h2 = jnp.dot(w2_ref[...], h1.astype(jnp.bfloat16),
                 preferred_element_type=jnp.float32) + b2
    h2 = jnp.maximum(h2, 0.0)                 # (H, TB) f32

    # Layer 3: Linear(H -> 1).  VPU multiply + sublane reduce (off the MXU).
    out = jnp.sum(w3 * h2, axis=0, keepdims=True) + b3_ref[0, 0]   # (1, TB)
    o_ref[...] = out.astype(o_ref.dtype)


def simplenet_forward(x, params, *, block_batch=8192):
    """Forward pass. x: (B, 1) float32.

    params (torch-native layouts):
      w1 (H, 1), b1 (H, 1), w2 (H, H), b2 (H, 1), w3 (1, H), b3 (1, 1)
    """
    w1, b1, w2, b2, w3, b3 = (params["w1"], params["b1"], params["w2"],
                              params["b2"], params["w3"], params["b3"])
    B = x.shape[0]
    H = w2.shape[0]

    # ---- batch tiling -------------------------------------------------
    # Lane-aligned tile, capped at 32768 (v7x 64 MiB VMEM headroom).
    b128 = _round_up(B, 128)
    tb = _round_up(min(max(block_batch, 128), b128, 32768), 128)
    n_steps = -(-b128 // tb)
    # Prefer >= 2 grid steps whenever the batch allows: uses both TCs on
    # v7x and restores DMA/compute overlap that a 1-step grid cannot have.
    if n_steps == 1 and b128 >= 256:
        n_steps = 2
    tb = _round_up(-(-b128 // n_steps), 128)
    b_pad = tb * n_steps
    grid = (n_steps,)

    # ---- layout plumbing (free reshapes; pad only if actually needed) --
    x_row = x.reshape(1, B)                   # contiguous -> free reshape
    if b_pad != B:
        x_row = jnp.pad(x_row, ((0, 0), (0, b_pad - B)))

    # Pack w1/b1/b2/w3 into one (H, 4) block; pre-cast w2 to bf16.
    wpack = jnp.concatenate(
        [w1, b1, b2, w3.reshape(H, 1)], axis=1).astype(jnp.float32)  # (H, 4)
    w2_bf16 = w2.astype(jnp.bfloat16)
    b3_scalar = b3.reshape(1, 1).astype(jnp.float32)

    out_row = pl.pallas_call(
        _simplenet_kernel,
        out_shape=jax.ShapeDtypeStruct((1, b_pad), jnp.float32),
        grid_spec=pltpu.PrefetchScalarGridSpec(
            num_scalar_prefetch=0,
            grid=grid,
            in_specs=[
                pl.BlockSpec((1, tb), lambda i: (0, i)),   # x tile (streams)
                pl.BlockSpec((H, 4), lambda i: (0, 0)),    # packed w1/b1/b2/w3
                pl.BlockSpec((H, H), lambda i: (0, 0)),    # w2 bf16 (resident)
                pl.BlockSpec(memory_space=pltpu.MemorySpace.SMEM),  # b3 scalar
            ],
            out_specs=pl.BlockSpec((1, tb), lambda i: (0, i)),
        ),
        compiler_params=pltpu.CompilerParams(
            dimension_semantics=("parallel",),
            vmem_limit_bytes=32 * 1024 * 1024),
    )(x_row, wpack, w2_bf16, b3_scalar)

    # Back to the PyTorch-style (B, 1) output (slice only if we padded).
    if b_pad != B:
        out_row = out_row[:, :B]
    return out_row.reshape(B, 1)


def init_params(key, hidden_size=64):
    """Deterministic init mimicking nn.Linear's uniform(-1/sqrt(fan_in), +).

    Weights kept in torch's (out, in) layout; biases as (out, 1) columns.
    """
    ks = jax.random.split(key, 6)

    def linear(kw, kb, fan_in, fan_out):
        bound = 1.0 / jnp.sqrt(jnp.float32(fan_in))
        w = jax.random.uniform(kw, (fan_out, fan_in), jnp.float32, -bound, bound)
        b = jax.random.uniform(kb, (fan_out, 1), jnp.float32, -bound, bound)
        return w, b

    w1, b1 = linear(ks[0], ks[1], 1, hidden_size)
    w2, b2 = linear(ks[2], ks[3], hidden_size, hidden_size)
    w3, b3 = linear(ks[4], ks[5], hidden_size, 1)
    return dict(w1=w1, b1=b1, w2=w2, b2=b2, w3=w3, b3=b3)


def _reference_forward(x, p):
    """Pure-JAX reference matching the kernel's bf16 layer-2 numerics."""
    h1 = jnp.maximum(x @ p["w1"].T + p["b1"].T, 0.0)
    h2 = jnp.dot(h1.astype(jnp.bfloat16), p["w2"].T.astype(jnp.bfloat16),
                 preferred_element_type=jnp.float32) + p["b2"].T
    h2 = jnp.maximum(h2, 0.0)
    return h2 @ p["w3"].T + p["b3"].T


if __name__ == "__main__":
    key = jax.random.PRNGKey(0)
    k_param, k_x = jax.random.split(key)

    hidden_size = 64
    batch = 1000   # non-multiple of 128: exercises padding + a multi-step grid

    params = init_params(k_param, hidden_size=hidden_size)
    x = jax.random.normal(k_x, (batch, 1), dtype=jnp.float32)

    out = simplenet_forward(x, params, block_batch=256)
    out = jax.block_until_ready(out)

    ref = _reference_forward(x, params)
    assert out.shape == (batch, 1)
    max_err = float(jnp.max(jnp.abs(out - ref)))
    assert jnp.allclose(out, ref, atol=2e-3, rtol=2e-3), max_err

    print("KERNEL_OK")
</pallas_src>

<mosaic_0001>
module attributes {stable_mosaic.version = 11 : i64} {
  func.func @_simplenet_kernel(%arg0: i32, %arg1: memref<1x256xf32, #tpu.memory_space<vmem>>, %arg2: memref<64x4xf32, #tpu.memory_space<vmem>>, %arg3: memref<64x64xbf16, #tpu.memory_space<vmem>>, %arg4: memref<1x1xf32, #tpu.memory_space<smem>>, %arg5: memref<1x256xf32, #tpu.memory_space<vmem>>) attributes {dimension_semantics = [#tpu.dimension_semantics<parallel>], iteration_bounds = array<i64: 4>, scalar_prefetch = 0 : i64, scratch_operands = 0 : i64, tpu.core_type = #tpu.core_type<tc>, window_params = [{transform_indices = @transform_0, window_bounds = array<i64: 1, 256>}, {pipeline_mode = #tpu.pipeline_mode<synchronous>, transform_indices = @transform_1, window_bounds = array<i64: 64, 4>}, {pipeline_mode = #tpu.pipeline_mode<synchronous>, transform_indices = @transform_2, window_bounds = array<i64: 64, 64>}, {transform_indices = @transform_3, window_bounds = array<i64: 1, 1>}, {transform_indices = @transform_4, window_bounds = array<i64: 1, 256>}]} {
    %c0 = arith.constant 0 : index
    %c0_0 = arith.constant 0 : index
    %0 = vector.load %arg1[%c0, %c0_0] : memref<1x256xf32, #tpu.memory_space<vmem>>, vector<1x256xf32>
    %c0_1 = arith.constant 0 : index
    %c0_2 = arith.constant 0 : index
    %1 = vector.load %arg2[%c0_1, %c0_2] : memref<64x4xf32, #tpu.memory_space<vmem>>, vector<64x4xf32>
    %2 = vector.extract_strided_slice %1 {offsets = [0, 0], sizes = [64, 1], strides = [1, 1]} : vector<64x4xf32> to vector<64x1xf32>
    %3 = vector.extract_strided_slice %1 {offsets = [0, 1], sizes = [64, 1], strides = [1, 1]} : vector<64x4xf32> to vector<64x1xf32>
    %4 = vector.extract_strided_slice %1 {offsets = [0, 2], sizes = [64, 1], strides = [1, 1]} : vector<64x4xf32> to vector<64x1xf32>
    %5 = vector.extract_strided_slice %1 {offsets = [0, 3], sizes = [64, 1], strides = [1, 1]} : vector<64x4xf32> to vector<64x1xf32>
    %6 = vector.broadcast %2 : vector<64x1xf32> to vector<64x256xf32>
    %7 = vector.broadcast %0 : vector<1x256xf32> to vector<64x256xf32>
    %8 = arith.mulf %6, %7 : vector<64x256xf32>
    %9 = vector.broadcast %3 : vector<64x1xf32> to vector<64x256xf32>
    %10 = arith.addf %8, %9 : vector<64x256xf32>
    %cst = arith.constant 0.000000e+00 : f32
    %11 = vector.broadcast %cst : f32 to vector<64x256xf32>
    %12 = arith.maximumf %10, %11 : vector<64x256xf32>
    %c0_3 = arith.constant 0 : index
    %c0_4 = arith.constant 0 : index
    %13 = vector.load %arg3[%c0_3, %c0_4] : memref<64x64xbf16, #tpu.memory_space<vmem>>, vector<64x64xbf16>
    %14 = arith.truncf %12 : vector<64x256xf32> to vector<64x256xbf16>
    %cst_5 = arith.constant dense<0.000000e+00> : vector<64x256xf32>
    %15 = tpu.matmul %13, %14, %cst_5 {dimension_numbers = #tpu.dot_dimension_numbers<[1], [0], [0], [1], [0, 0, 1, 1], [], []>} : vector<64x64xbf16>, vector<64x256xbf16>, vector<64x256xf32> -> vector<64x256xf32>
    %16 = vector.broadcast %4 : vector<64x1xf32> to vector<64x256xf32>
    %17 = arith.addf %15, %16 : vector<64x256xf32>
    %cst_6 = arith.constant 0.000000e+00 : f32
    %18 = vector.broadcast %cst_6 : f32 to vector<64x256xf32>
    %19 = arith.maximumf %17, %18 : vector<64x256xf32>
    %20 = vector.broadcast %5 : vector<64x1xf32> to vector<64x256xf32>
    %21 = arith.mulf %20, %19 : vector<64x256xf32>
    %cst_7 = arith.constant dense<0.000000e+00> : vector<256xf32>
    %22 = vector.multi_reduction <add>, %21, %cst_7 [0] : vector<64x256xf32> to vector<256xf32>
    %23 = vector.shape_cast %22 : vector<256xf32> to vector<1x256xf32>
    %c0_8 = arith.constant 0 : index
    %c0_9 = arith.constant 0 : index
    %24 = memref.load %arg4[%c0_8, %c0_9] : memref<1x1xf32, #tpu.memory_space<smem>>
    %25 = vector.broadcast %24 : f32 to vector<1x256xf32>
    %26 = arith.addf %23, %25 : vector<1x256xf32>
    %c0_10 = arith.constant 0 : index
    %c0_11 = arith.constant 0 : index
    %27 = vector.load %arg5[%c0_10, %c0_11] : memref<1x256xf32, #tpu.memory_space<vmem>>, vector<1x256xf32>
    tpu.vector_store %arg5[%c0_10, %c0_11], %26 {strides = array<i32>} : memref<1x256xf32, #tpu.memory_space<vmem>>, vector<1x256xf32>,
    return
  }
  func.func @transform_0(%arg0: i32) -> (i32, i32) {
    %c0_i32 = arith.constant 0 : i32
    %c0_i32_0 = arith.constant 0 : i32
    return %c0_i32, %arg0 : i32, i32
  }
  func.func @transform_1(%arg0: i32) -> (i32, i32) {
    %c0_i32 = arith.constant 0 : i32
    %c0_i32_0 = arith.constant 0 : i32
    %c0_i32_1 = arith.constant 0 : i32
    return %c0_i32, %c0_i32_0 : i32, i32
  }
  func.func @transform_2(%arg0: i32) -> (i32, i32) {
    %c0_i32 = arith.constant 0 : i32
    %c0_i32_0 = arith.constant 0 : i32
    %c0_i32_1 = arith.constant 0 : i32
    return %c0_i32, %c0_i32_0 : i32, i32
  }
  func.func @transform_3(%arg0: i32) -> (i32, i32) {
    %c0_i32 = arith.constant 0 : i32
    %c0_i32_0 = arith.constant 0 : i32
    %c0_i32_1 = arith.constant 0 : i32
    return %c0_i32, %c0_i32_0 : i32, i32
  }
  func.func @transform_4(%arg0: i32) -> (i32, i32) {
    %c0_i32 = arith.constant 0 : i32
    %c0_i32_0 = arith.constant 0 : i32
    return %c0_i32, %arg0 : i32, i32
  }
}

</mosaic_0001>

<bundles_post_ra>
// kernel: tpu_custom_call.1
= control target key start
LH: loop header
LB: loop body
LE: loop exit
PB: predicated region body
PF: predicated region fallthrough
CT: control target
= control target key end

     0   :  { %s1040_s0 = inlined_call_operand.vmem [shape: f32[1,1024], index: 0, kind: input, shape index: {}]   ;;  %s1041_s1 = inlined_call_operand.vmem [shape: f32[64,4], index: 1, kind: input, shape index: {}]   ;;  %s1042_s2 = inlined_call_operand.vmem [shape: bf16[64,64], index: 2, kind: input, shape index: {}]   ;;  %s1043_s3 = inlined_call_operand.<no memory space> [shape: f32[1,1], index: 3, kind: input, shape index: {}]   ;;  %s1044_s4 = inlined_call_operand.hbm [shape: f32[1,1024], index: 4, kind: output, shape index: {}]  }
   0x1   :  { %9 = sst [smem:[#allocation2]] %s1043_s3 }
   0x2   :  { %10 = vsyncpa [#allocation4], 0 }
   0x3   :  { %12 = vsyncpa [#allocation4 + $0x1], 0  ;;  %s870_s17 = smov 0   ;;  %s872_s18 = smov 0  }
   0x4   :  { %s874_s19 = smov 0   ;;  %s876_s20 = smov 0  }
   0x5 LB: > { %s891_s3 = sadd.s32 4294967295, %s834_s20   ;;  %s680_s21 = sadd.s32 4294967294, %s834_s20   ;;  %s834_s20 = sphi %s876_s20, %s1050_s20   ;;  %s830_s19 = sphi %s874_s19, %s1049_s19   ;;  %s826_s18 = sphi %s872_s18, %s1048_s18   ;;  %s822_s17 = sphi %s870_s17, %s1047_s17  }
   0x6   : > { %s895_s22 = sadd.s32 1, %s834_s20   ;;  %s114_s23 = sadd.s32 1, %s830_s19 }
   0x7   : > { %s111_s24 = ssub.s32 %s834_s20, %s895_s22  ;;  %p124_p0 = scmp.ne.s32.totalorder %s830_s19, %s826_s18 }
   0x8   : > { %p112_p1 = scmp.eq.s32.totalorder %s111_s24, 0  ;;  %p125_p2 = scmp.eq.s32.totalorder %s891_s3, 3 }
   0x9   : > { %p130_p3 = scmp.ne.s32.totalorder %s826_s18, %s822_s17  ;;  %p131_p4 = scmp.eq.s32.totalorder %s680_s21, 3 }
   0xa   : > { %s906_s25 = scalar_select %p112_p1, %s830_s19, %s114_s23  }
   0xb   : > { %p908_p5 = por %p125_p2, %p124_p0  ;;  %p912_p6 = por %p131_p4, %p130_p3 }
   0xc   : > { %p683_p7 = scmp.ge.s32.totalorder %s834_s20, 1  ;;  %p166_p8 = scmp.lt.s32.totalorder %s834_s20, 5 }
   0xe   : > { %p167_p9 = pnand %p683_p7, %p166_p8 }
   0xf   : > { %v201_v0 = vld [vmem:[%s1041_s1 + $0x10] sm:$0xff] (!%p167_p9)  ;;  %v199_v1 = vld [vmem:[%s1041_s1] sm:$0xff] (!%p167_p9)  ;;  %v836_v2 = vmov (!%p167_p9), 1   ;;  %v200_v3 = vld [vmem:[%s1041_s1 + $0x8] sm:$0xff] (!%p167_p9)  ;;  %v837_v4 = vmov (!%p167_p9), 0   ;;  %v838_v10 = vmov (!%p167_p9), 2   ;;  %v248_v12 = vlaneseq (!%p167_p9) }
  0x10   : > { %170 = sbr.rel (%p167_p9) target bundleno = 466 (0x1d2), region = 36  ;;  %754 = vset.pattern.permute.xlu0 (!%p167_p9), %v836_v2  ;;  %752 = vset.pattern.permute.xlu1 (!%p167_p9), %v836_v2  ;;  %v202_v5 = vld [vmem:[%s1041_s1 + $0x18] sm:$0xff] (!%p167_p9)  ;;  %v204_v6 = vld [vmem:[%s1041_s1 + $0x28] sm:$0xff] (!%p167_p9)  ;;  %v203_v7 = vld [vmem:[%s1041_s1 + $0x20] sm:$0xff] (!%p167_p9)  ;;  %v839_v11 = vmov (!%p167_p9), 3   ;;  %s685_s23 = sshll.u32 (!%p167_p9), %s891_s3, 1 }
  0x11   : > { %283 = vperm.xlu0 (!%p167_p9), %754, %v201_v0   ;;  %275 = vperm.xlu1 (!%p167_p9), %752, %v199_v1   ;;  %v205_v8 = vld [vmem:[%s1041_s1 + $0x30] sm:$0xff] (!%p167_p9)  ;;  %v206_v9 = vld [vmem:[%s1041_s1 + $0x38] sm:$0xff] (!%p167_p9)  ;;  %p192_p10 = scmp.lt.s32.totalorder (!%p167_p9), %s685_s23, 7  ;;  %v950_v13 = vshrl.u32 (!%p167_p9), %v248_v12, 7  ;;  %vm406_vm0 = vcmask (!%p167_p9), 523264   ;;  %s582_s12 = sld [smem:[#allocation2]] (!%p167_p9) }
  0x12   : > { %451 = vmatprep.mubr.bf16.mxu0 (!%p167_p9), %v837_v4  ;;  %471 = vmatprep.mubr.bf16.mxu1 (!%p167_p9), %v837_v4  ;;  %s188_s13 = sand.u32 (!%p167_p9), 1, %s826_s18   ;;  %s699_s15 = sshll.u32 (!%p167_p9), %s891_s3, 5  ;;  %vm606_vm1 = vcmp.lt.s32.totalorder (!%p167_p9), %v248_v12, 256 }
  0x13   : > { %v250_v14 = vsub.s32 (!%p167_p9), 0, %v950_v13  ;;  %v254_v15 = vsub.s32 (!%p167_p9), 1, %v950_v13  ;;  %s684_s14 = sshll.u32 (!%p167_p9), %s188_s13, 1  ;;  %s998_s28 = scalar_lea.hbm (!%p167_p9), %s1044_s4, %s699_s15 }
  0x14   : > { %s190_s16 = scalar_lea.vmem (!%p167_p9), [#allocation3], %s684_s14  ;;  %s841_s3 = smov (!%p167_p9), [#allocation3]  }
  0x15   : > { %755 = vset.pattern.permute.xlu0 (!%p167_p9), %v837_v4  ;;  %279 = vperm.xlu1 (!%p167_p9), %752, %v200_v3   ;;  %s624_s21 = sshll.u32 (!%p167_p9), %s190_s16, 4  ;;  %s776_s5 = sshll.u32 (!%p167_p9), %s841_s3, 4  ;;  %s1000_s21 = int_to_ptr.vmem [resolvable:$true] %s624_s21  ;;  %s777_s5 = int_to_ptr.vmem [resolvable:$false] %s776_s5 }
  0x16   : > { %209 = vperm.xlu0 (!%p167_p9), %755, %v199_v1   ;;  %s772_s30 = scalar_lea.vmem (!%p167_p9), %s1000_s21, 32  ;;  %s778_s6 = scalar_lea.vmem (!%p167_p9), %s777_s5, 64 }
  0x17   : > { %s1052_s23 = smov (!%p192_p10, %s685_s23), 7  ;;  %p773_p11 = scmp.ne.s32.totalorder %s1000_s21, %s772_s30 }
  0x18   : > { %s194_s29 = scalar_lea.vmem %s1040_s0, %s1052_s23  ;;  %p779_p0 = scmp.lt.s32.totalorder %s1000_s21, %s777_s5 }
  0x19   : > { %753 = vset.pattern.permute.xlu1 %v837_v4  ;;  %v198_v16 = vld [vmem:[%s194_s29] sm:$0x3]  ;;  %s610_s29 = scalar_lea.sflag [#allocation4], %s188_s13  ;;  %p774_p12 = pnand %p773_p11, %p908_p5 }
  0x1a   : > { %214 = vperm.xlu0 %755, %v200_v3   ;;  %224 = vperm.xlu1 %753, %v202_v5   ;;  %v957_v19 = vrot.slane %v198_v16, %v250_v14  ;;  %v959_v20 = vrot.slane %v198_v16, %v254_v15  ;;  %p780_p1 = scmp.lt.s32.totalorder %s778_s6, %s772_s30 }
  0x1b   : > { %p775_p13 = pneg %p774_p12 }
  0x1c   : > { %p781_p2 = por %p780_p1, %p779_p0 }
  0x1e   : > { %219 = vperm.xlu0 %755, %v201_v0   ;;  %756 = vset.pattern.permute.xlu1 %v836_v2  ;;  %p782_p3 = pnand %p781_p2, %p775_p13 }
  0x1f   : > { %287 = vperm.xlu1 %756, %v202_v5  }
  0x22   : > { %234 = vperm.xlu0 %755, %v204_v6  }
  0x23   : > { %757 = vset.pattern.permute.xlu1 %v837_v4 }
  0x24   : > { %229 = vperm.xlu1 %757, %v203_v7  }
  0x26   : > { %239 = vperm.xlu0 %755, %v205_v8  }
  0x28   : > { %758 = vset.pattern.permute.xlu1 %v836_v2 }
  0x29   : > { %291 = vperm.xlu1 %758, %v203_v7  }
  0x2a   : > { %760 = vset.pattern.permute.xlu0 %v836_v2 }
  0x2b   : > { %299 = vperm.xlu0 %760, %v205_v8  }
  0x2d   : > { %295 = vperm.xlu1 %758, %v204_v6  }
  0x2f   : > { %763 = vset.pattern.permute.xlu0 %v838_v10 }
  0x30   : > { %359 = vperm.xlu0 %763, %v200_v3  }
  0x31   : > { %759 = vset.pattern.permute.xlu1 %v837_v4 }
  0x32   : > { %244 = vperm.xlu1 %759, %v206_v9  }
  0x34   : > { %764 = vset.pattern.permute.xlu0 %v839_v11 }
  0x35   : > { %509 = vperm.xlu0 %764, %v199_v1  }
  0x36   : > { %761 = vset.pattern.permute.xlu1 %v836_v2 }
  0x37   : > { %303 = vperm.xlu1 %761, %v206_v9  }
  0x39   : > { %517 = vperm.xlu0 %764, %v201_v0  }
  0x3b   : > { %762 = vset.pattern.permute.xlu1 %v838_v10 }
  0x3c   : > { %355 = vperm.xlu1 %762, %v199_v1  }
  0x3d   : > { %521 = vperm.xlu0 %764, %v202_v5  }
  0x40   : > { %363 = vperm.xlu1 %762, %v201_v0  }
  0x41   : > { %525 = vperm.xlu0 %764, %v203_v7  }
  0x44   : > { %367 = vperm.xlu1 %762, %v202_v5  }
  0x45   : > { %529 = vperm.xlu0 %764, %v204_v6  }
  0x48   : > { %765 = vset.pattern.permute.xlu1 %v839_v11 }
  0x49   : > { %513 = vperm.xlu1 %765, %v200_v3   ;;  %537 = vperm.xlu0 %764, %v206_v9  }
  0x4d   : > { %766 = vset.pattern.permute.xlu1 %v838_v10 }
  0x4e   : > { %371 = vperm.xlu1 %766, %v203_v7  }
  0x52   : > { %375 = vperm.xlu1 %766, %v204_v6  }
  0x56   : > { %379 = vperm.xlu1 %766, %v205_v8  }
  0x5a   : > { %383 = vperm.xlu1 %766, %v206_v9  }
  0x5e   : > { %767 = vset.pattern.permute.xlu1 %v839_v11 }
  0x5f   : > { %533 = vperm.xlu1 %767, %v205_v8  }
  0x90   : > { %v276_v17 = vpop.permute.xlu1 %275  ;;  %v284_v18 = vpop.permute.xlu0 %283 }
  0x94   : > { %v280_v21 = vpop.permute.xlu1 %279 }
  0x95   : > { %v210_v22 = vpop.permute.xlu0 %209 }
  0x96   : > { %v258_v23 = vmul.f32 %v957_v19, %v210_v22  ;;  %v259_v24 = vmul.f32 %v959_v20, %v210_v22 }
  0x98   : > { %v306_v25 = vadd.f32 %v276_v17, %v258_v23  ;;  %v307_v26 = vadd.f32 %v276_v17, %v259_v24 }
  0x99   : > { %v215_v27 = vpop.permute.xlu0 %214  ;;  %v225_v28 = vpop.permute.xlu1 %224 }
  0x9a   : > { %v260_v29 = vmul.f32 %v957_v19, %v215_v27  ;;  %v261_v30 = vmul.f32 %v959_v20, %v215_v27  ;;  %v264_v33 = vmul.f32 %v957_v19, %v225_v28  ;;  %v265_v34 = vmul.f32 %v959_v20, %v225_v28 }
  0x9b   : > { %v323_v36 = vmax.f32 %v307_v26, 0.0  ;;  %v322_v37 = vmax.f32 %v306_v25, 0.0 }
  0x9c   : > { %v308_v31 = vadd.f32 %v280_v21, %v260_v29  ;;  %v309_v32 = vadd.f32 %v280_v21, %v261_v30 }
  0x9d   : > { %v220_v35 = vpop.permute.xlu0 %219 }
  0x9e   : > { %v262_v38 = vmul.f32 %v957_v19, %v220_v35  ;;  %v263_v39 = vmul.f32 %v959_v20, %v220_v35  ;;  %v288_v40 = vpop.permute.xlu1 %287  ;;  %v325_v41 = vmax.f32 %v309_v32, 0.0  ;;  %v324_v42 = vmax.f32 %v308_v31, 0.0  ;;  %v768_v32 = vld [vmem:[%s1042_s2] sm:$0xff]  }
  0x9f   : > { %v312_v43 = vadd.f32 %v288_v40, %v264_v33  ;;  %v313_v44 = vadd.f32 %v288_v40, %v265_v34  ;;  %v771_v33 = vld [vmem:[%s1042_s2 + $0x18] sm:$0xff]  }
  0xa0   : > { %v310_v45 = vadd.f32 %v284_v18, %v262_v38  ;;  %v311_v46 = vadd.f32 %v284_v18, %v263_v39  ;;  %v347_v47 = vpack.c.bf16 %v325_v41, %v323_v36  ;;  %v346_v48 = vpack.c.bf16 %v324_v42, %v322_v37 }
  0xa1   : > { %v328_v49 = vmax.f32 %v312_v43, 0.0  ;;  %v329_v50 = vmax.f32 %v313_v44, 0.0  ;;  %v235_v56 = vpop.permute.xlu0 %234 }
  0xa2   : > { %v326_v51 = vmax.f32 %v310_v45, 0.0  ;;  %v327_v52 = vmax.f32 %v311_v46, 0.0  ;;  %419 = vmatprep.subr.bf16.mxu0 %v347_v47  ;;  %700 = vmatprep.subr.bf16.mxu1 %v347_v47  ;;  %v268_v60 = vmul.f32 %v957_v19, %v235_v56  ;;  %v269_v61 = vmul.f32 %v959_v20, %v235_v56 }
  0xa3   : > { %v230_v53 = vpop.permute.xlu1 %229  ;;  %420 = vmatpush1.bf16.msra.mxu0 %v346_v48  ;;  %704 = vmatpush1.bf16.msra.mxu1 %v346_v48 }
  0xa4   : > { %v349_v54 = vpack.c.bf16 %v329_v50, %v327_v52  ;;  %v348_v55 = vpack.c.bf16 %v328_v49, %v326_v51  ;;  %v266_v58 = vmul.f32 %v957_v19, %v230_v53  ;;  %v267_v59 = vmul.f32 %v959_v20, %v230_v53 }
  0xa5   : > { %v240_v0 = vpop.permute.xlu0 %239 }
  0xa6   : > { %421 = vmatprep.subr.bf16.mxu0 %v349_v54  ;;  %701 = vmatprep.subr.bf16.mxu1 %v349_v54  ;;  %v270_v15 = vmul.f32 %v957_v19, %v240_v0  ;;  %v271_v16 = vmul.f32 %v959_v20, %v240_v0 }
  0xa7   : > { %422 = vmatpush1.bf16.msra.mxu0 %v348_v55  ;;  %705 = vmatpush1.bf16.msra.mxu1 %v348_v55 }
  0xa8   : > { %v292_v57 = vpop.permute.xlu1 %291 }
  0xa9   : > { %v314_v62 = vadd.f32 %v292_v57, %v266_v58  ;;  %v315_v63 = vadd.f32 %v292_v57, %v267_v59 }
  0xaa   : > { %v300_v14 = vpop.permute.xlu0 %299 }
  0xab   : > { %v330_v5 = vmax.f32 %v314_v62, 0.0  ;;  %v331_v6 = vmax.f32 %v315_v63, 0.0  ;;  %v318_v17 = vadd.f32 %v300_v14, %v270_v15  ;;  %v319_v18 = vadd.f32 %v300_v14, %v271_v16 }
  0xac   : > { %v296_v1 = vpop.permute.xlu1 %295 }
  0xad   : > { %v316_v2 = vadd.f32 %v296_v1, %v268_v60  ;;  %v317_v3 = vadd.f32 %v296_v1, %v269_v61  ;;  %v334_v26 = vmax.f32 %v318_v17, 0.0  ;;  %v335_v27 = vmax.f32 %v319_v18, 0.0 }
  0xaf   : > { %v332_v7 = vmax.f32 %v316_v2, 0.0  ;;  %v333_v8 = vmax.f32 %v317_v3, 0.0  ;;  %v360_v36 = vpop.permute.xlu0 %359 }
  0xb1   : > { %v245_v9 = vpop.permute.xlu1 %244  ;;  %v351_v10 = vpack.c.bf16 %v333_v8, %v331_v6  ;;  %v350_v11 = vpack.c.bf16 %v332_v7, %v330_v5 }
  0xb2   : > { %v272_v21 = vmul.f32 %v957_v19, %v245_v9  ;;  %v273_v22 = vmul.f32 %v959_v20, %v245_v9  ;;  %v769_v19 = vld [vmem:[%s1042_s2 + $0x10] sm:$0xff]   ;;  %v770_v20 = vld [vmem:[%s1042_s2 + $0x8] sm:$0xff]  }
  0xb3   : > { %423 = vmatprep.subr.bf16.mxu0 %v351_v10  ;;  %702 = vmatprep.subr.bf16.mxu1 %v351_v10 }
  0xb4   : > { %424 = vmatpush1.bf16.msra.mxu0 %v350_v11  ;;  %706 = vmatpush1.bf16.msra.mxu1 %v350_v11  ;;  %v510_v38 = vpop.permute.xlu0 %509 }
  0xb6   : > { %v304_v23 = vpop.permute.xlu1 %303 }
  0xb7   : > { %v320_v24 = vadd.f32 %v304_v23, %v272_v21  ;;  %v321_v25 = vadd.f32 %v304_v23, %v273_v22 }
  0xb8   : > { %v518_v40 = vpop.permute.xlu0 %517 }
  0xb9   : > { %v336_v28 = vmax.f32 %v320_v24, 0.0  ;;  %v337_v29 = vmax.f32 %v321_v25, 0.0 }
  0xbb   : > { %v353_v30 = vpack.c.bf16 %v337_v29, %v335_v27  ;;  %v352_v31 = vpack.c.bf16 %v336_v28, %v334_v26  ;;  %v356_v34 = vpop.permute.xlu1 %355 }
  0xbc   : > { %v522_v42 = vpop.permute.xlu0 %521 }
  0xbd   : > { %425 = vmatprep.subr.bf16.mxu0 %v353_v30  ;;  %703 = vmatprep.subr.bf16.mxu1 %v353_v30 }
  0xbe   : > { %426 = vmatpush1.bf16.msra.mxu0 %v352_v31  ;;  %707 = vmatpush1.bf16.msra.mxu1 %v352_v31 }
  0xbf   : > { %v364_v35 = vpop.permute.xlu1 %363 }
  0xc0   : > { %v526_v59 = vpop.permute.xlu0 %525 }
  0xc1   : > { %690 = vmatmul.mubr.msk.bf16.vlgmr.msra.gmra.mrb[0].mxu0 %vm406_vm0, %v768_v32  ;;  %692 = vmatmul.mubr.msk.bf16.vlgmr.msra.gmra.mrb[0].mxu1 %vm406_vm0, %v769_v19 }
  0xc2   : > { %461 = vmatprep.mubr.bf16.mxu0 %v837_v4  ;;  %481 = vmatprep.mubr.bf16.mxu1 %v837_v4 }
  0xc3   : > { %v368_v37 = vpop.permute.xlu1 %367 }
  0xc8   : > { %v514_v39 = vpop.permute.xlu1 %513 }
  0xc9   : > { %691 = vmatmul.mubr.msk.bf16.gmra.mrb[4].mxu0 %vm406_vm0, %v770_v20  ;;  %693 = vmatmul.mubr.msk.bf16.gmra.mrb[4].mxu1 %vm406_vm0, %v771_v33 }
  0xcd   : > { %v372_v41 = vpop.permute.xlu1 %371 }
  0xd1   : > { %v376_v4 = vpop.permute.xlu1 %375 }
  0xd5   : > { %v380_v60 = vpop.permute.xlu1 %379 }
  0xd9   : > { %v384_v31 = vpop.permute.xlu1 %383 }
 0x194   : > { %v453_v43 = vpop.f32.mrb[0].mxu0  ;;  %v473_v44 = vpop.f32.mrb[0].mxu1 }
 0x195   : > { %v454_v45 = vadd.f32 %v453_v43, %v356_v34  ;;  %v455_v46 = vpop.f32.mrb[1].mxu0  ;;  %v475_v47 = vpop.f32.mrb[1].mxu1  ;;  %v474_v3 = vadd.f32 %v473_v44, %v372_v41 }
 0x196   : > { %v456_v48 = vadd.f32 %v455_v46, %v356_v34  ;;  %v457_v49 = vpop.f32.mrb[2].mxu0  ;;  %v477_v50 = vpop.f32.mrb[2].mxu1  ;;  %v476_v9 = vadd.f32 %v475_v47, %v372_v41 }
 0x197   : > { %v492_v51 = vmax.f32 %v454_v45, 0.0  ;;  %v458_v52 = vadd.f32 %v457_v49, %v360_v36  ;;  %v459_v53 = vpop.f32.mrb[3].mxu0  ;;  %v479_v54 = vpop.f32.mrb[3].mxu1  ;;  %v478_v16 = vadd.f32 %v477_v50, %v376_v4  ;;  %v500_v26 = vmax.f32 %v474_v3, 0.0 }
 0x198   : > { %v493_v55 = vmax.f32 %v456_v48, 0.0  ;;  %v460_v56 = vadd.f32 %v459_v53, %v360_v36  ;;  %v480_v23 = vadd.f32 %v479_v54, %v376_v4  ;;  %v501_v30 = vmax.f32 %v476_v9, 0.0  ;;  %v534_v49 = vpop.permute.xlu1 %533 }
 0x199   : > { %v494_v57 = vmax.f32 %v458_v52, 0.0  ;;  %v540_v61 = vmul.f32 %v510_v38, %v492_v51  ;;  %v502_v33 = vmax.f32 %v478_v16, 0.0  ;;  %v548_v44 = vmul.f32 %v526_v59, %v500_v26 }
 0x19a   : > { %v495_v58 = vmax.f32 %v460_v56, 0.0  ;;  %v541_v63 = vmul.f32 %v510_v38, %v493_v55  ;;  %v530_v38 = vpop.permute.xlu0 %529  ;;  %v549_v46 = vmul.f32 %v526_v59, %v501_v30 }
 0x19b   : > { %v542_v62 = vmul.f32 %v514_v39, %v494_v57  ;;  %v550_v50 = vmul.f32 %v530_v38, %v502_v33 }
 0x19c   : > { %v543_v0 = vmul.f32 %v514_v39, %v495_v58  ;;  %v463_v1 = vpop.f32.mrb[4].mxu0  ;;  %v483_v2 = vpop.f32.mrb[4].mxu1  ;;  %v503_v39 = vmax.f32 %v480_v23, 0.0 }
 0x19d   : > { %v556_v5 = vadd.f32 %v542_v62, %v540_v61  ;;  %v464_v6 = vadd.f32 %v463_v1, %v364_v35  ;;  %v465_v7 = vpop.f32.mrb[5].mxu0  ;;  %v485_v8 = vpop.f32.mrb[5].mxu1  ;;  %v484_v28 = vadd.f32 %v483_v2, %v380_v60 }
 0x19e   : > { %v569_v10 = vadd.f32 %v543_v0, %v541_v63  ;;  %v466_v11 = vadd.f32 %v465_v7, %v364_v35  ;;  %v467_v14 = vpop.f32.mrb[6].mxu0  ;;  %v487_v15 = vpop.f32.mrb[6].mxu1  ;;  %v486_v19 = vadd.f32 %v485_v8, %v380_v60  ;;  %v551_v52 = vmul.f32 %v530_v38, %v503_v39 }
 0x19f   : > { %v496_v17 = vmax.f32 %v464_v6, 0.0  ;;  %v468_v18 = vadd.f32 %v467_v14, %v368_v37  ;;  %v469_v21 = vpop.f32.mrb[7].mxu0  ;;  %v489_v22 = vpop.f32.mrb[7].mxu1  ;;  %v488_v36 = vadd.f32 %v487_v15, %v384_v31  ;;  %v840_v8 = vmov 1966171168  }
 0x1a0   : > { %v497_v24 = vmax.f32 %v466_v11, 0.0  ;;  %v470_v25 = vadd.f32 %v469_v21, %v368_v37  ;;  %v490_v4 = vadd.f32 %v489_v22, %v384_v31  ;;  %v504_v37 = vmax.f32 %v484_v28, 0.0  ;;  %v538_v57 = vpop.permute.xlu0 %537 }
 0x1a1   : > { %v544_v27 = vmul.f32 %v518_v40, %v496_v17  ;;  %v498_v29 = vmax.f32 %v468_v18, 0.0  ;;  %v505_v47 = vmax.f32 %v486_v19, 0.0  ;;  %v590_v9 = vunpack.c.l.s4 %v840_v8 }
 0x1a2   : > { %v545_v32 = vmul.f32 %v518_v40, %v497_v24  ;;  %v499_v20 = vmax.f32 %v470_v25, 0.0  ;;  %v506_v40 = vmax.f32 %v488_v36, 0.0  ;;  %v507_v53 = vmax.f32 %v490_v4, 0.0 }
 0x1a3   : > { %v557_v34 = vadd.f32 %v556_v5, %v544_v27  ;;  %v546_v35 = vmul.f32 %v522_v42, %v498_v29  ;;  %v552_v55 = vmul.f32 %v534_v49, %v504_v37  ;;  %v553_v58 = vmul.f32 %v534_v49, %v505_v47 }
 0x1a4   : > { %v570_v41 = vadd.f32 %v569_v10, %v545_v32  ;;  %v547_v43 = vmul.f32 %v522_v42, %v499_v20  ;;  %v554_v42 = vmul.f32 %v538_v57, %v506_v40  ;;  %v555_v62 = vmul.f32 %v538_v57, %v507_v53 }
 0x1a5   : > { %v558_v45 = vadd.f32 %v557_v34, %v546_v35  ;;  %v583_v15 = vstv %s582_s12  ;;  %v591_v17 = vunpack.c.0.s8 %v590_v9 }
 0x1a6   : > { %v571_v48 = vadd.f32 %v570_v41, %v547_v43 }
 0x1a7   : > { %v559_v51 = vadd.f32 %v558_v45, %v548_v44  ;;  %v594_v24 = vsub.s32 %v591_v17, %v950_v13 }
 0x1a8   : > { %v572_v54 = vadd.f32 %v571_v48, %v549_v46 }
 0x1a9   : > { %v560_v56 = vadd.f32 %v559_v51, %v550_v50 }
 0x1aa   : > { %v573_v60 = vadd.f32 %v572_v54, %v551_v52 }
 0x1ab   : > { %v561_v61 = vadd.f32 %v560_v56, %v552_v55 }
 0x1ac   : > { %v574_v63 = vadd.f32 %v573_v60, %v553_v58 }
 0x1ad   : > { %v562_v59 = vadd.f32 %v561_v61, %v554_v42 }
 0x1ae   : > { %v575_v0 = vadd.f32 %v574_v63, %v555_v62 }
 0x1af   : > { %v563_v1 = vrot.slane %v562_v59, 4 }
 0x1b0   : > { %v576_v2 = vrot.slane %v575_v0, 4 }
 0x1b1   : > { %v564_v3 = vadd.f32 %v563_v1, %v562_v59 }
 0x1b2   : > { %v577_v5 = vadd.f32 %v576_v2, %v575_v0 }
 0x1b3   : > { %v565_v6 = vrot.slane %v564_v3, 2 }
 0x1b4   : > { %v578_v7 = vrot.slane %v577_v5, 2 }
 0x1b5   : > { %v566_v10 = vadd.f32 %v565_v6, %v564_v3 }
 0x1b6   : > { %v579_v11 = vadd.f32 %v578_v7, %v577_v5 }
 0x1b7   : > { %v567_v14 = vrot.slane %v566_v10, 1 }
 0x1b8   : > { %v580_v16 = vrot.slane %v579_v11, 1 }
 0x1b9   : > { %v568_v18 = vadd.f32 %v567_v14, %v566_v10 }
 0x1ba   : > { %v581_v21 = vadd.f32 %v580_v16, %v579_v11 }
 0x1bb   : > { %v584_v22 = vadd.f32 %v583_v15, %v568_v18 }
 0x1bc   : > { %v585_v23 = vadd.f32 %v583_v15, %v581_v21 }
 0x1be   : > { %v588_v25 = vcombine.low %v584_v22, %v585_v23 }
 0x1c0   : > { %v595_v26 = vrot.slane %v588_v25, %v594_v24 }
 0x1c2   : > { %v602_v27 = vrot.slane %v595_v26, %v594_v24 }
 0x1c4   : > { %608 = vst.msk [vmem:[%s190_s16] sm:$0x3] %vm606_vm1, %v602_v27 }
 0x1c5   : > { %785 = shalt.err (!%p782_p3)
}
 0x1c6   : > { %s786_s7 = scalar_lea.hbm %s998_s28, 32  ;;  %s790_s10 = scalar_lea.hbm %s1044_s4, 128 }
 0x1c7   : > { %p787_p4 = scmp.ne.s32.totalorder %s998_s28, %s786_s7  ;;  %p791_p9 = scmp.lt.u32.totalorder %s998_s28, %s1044_s4 }
 0x1c8   : > { %p792_p10 = scmp.lt.u32.totalorder %s790_s10, %s786_s7  ;;  %p794_p12 = scmp.lt.u32.totalorder %s786_s7, %s998_s28 }
 0x1c9   : > { %p788_p7 = pnand %p787_p4, %p908_p5 }
 0x1ca   : > { %p793_p11 = por %p792_p10, %p791_p9 }
 0x1cb   : > { %p789_p8 = pneg %p788_p7 }
 0x1cc   : > { %p795_p13 = por %p794_p12, %p793_p11 }
 0x1ce   : > { %p796_p0 = pnand %p795_p13, %p789_p8 }
 0x1d0   : > { %799 = shalt.err (!%p796_p0)
}
 0x1d1   : > { %708 = dma.vmem_to_hbm [thread:$0]  (%p908_p5), %s1000_s21, 32, %s998_s28, %s610_s29  }
 0x1d2 PF: > { %p714_p1 = scmp.ge.s32.totalorder %s834_s20, 2  ;;  %s636_s13 = sand.u32 1, %s822_s17  }
 0x1d3   : > { %s637_s14 = scalar_lea.sflag [#allocation4], %s636_s13 }
 0x1d4   : > { %p711_p2 = pnand %p714_p1, %p912_p6 }
 0x1d6   : > { %817 = dma.done.wait (!%p711_p2), %s637_s14, 32  }
 0x1d7   : > { %819 = vsyncadd (!%p711_p2), %s637_s14, 4294967264  ;;  %p15_p3 = scmp.ge.s32.totalorder %s895_s22, 6   ;;  %s1047_s17 = smov %s826_s18 }
 0x1d8   : > { %s1048_s18 = smov %s830_s19  ;;  %s1049_s19 = smov %s906_s25 }
 0x1d9   : > { %s1050_s20 = smov %s895_s22  ;;  %17 = sbr.rel (!%p15_p3) target bundleno = 5 (0x5), region = 71 }
 0x1e0   :  { %642 = vsyncpa [#allocation4], 1 }
 0x1e1   :  { %644 = vsyncpa [#allocation4 + $0x1], 1 }

</bundles_post_ra>
